<compile_context>
chip_gen: v5e
topology: v5e:2x2
jax: 0.10.0
libtpu: 0.0.40
codegen_flags: <defaults>
</compile_context>

<pallas_src>
import functools

import jax
import jax.numpy as jnp
from jax.experimental import pallas as pl
from jax.experimental.pallas import tpu as pltpu


def _avg_head_kernel(x_ref, o_ref, *, inv_s):
    # x_ref: (n_t, c_t, S) block; o_ref: (n_t, c_t) block.
    # Accumulate the sum in f32 (no whole-tile f32 temporary), then scale by
    # the global 1/S (block spans the entire S axis, so this is exact).
    acc = jnp.sum(x_ref[...], axis=-1, dtype=jnp.float32)
    o_ref[...] = (acc * inv_s).astype(o_ref.dtype)


def _vmem_capacity_bytes():
    """Best-effort VMEM capacity query; conservative (v7x-sized) fallback."""
    try:
        info = pltpu.get_tpu_info()
        for attr in ("vmem_capacity_bytes", "vmem_bytes", "vmem_size_bytes"):
            v = getattr(info, attr, None)
            if v:
                return int(v)
    except Exception:
        pass
    return 64 << 20  # v7x per-TC VMEM; safe lower bound everywhere


def _generation_budgets():
    """(target_block_bytes, vmem_limit_bytes) derived from VMEM capacity.

    v5e/v6e (128 MiB): 16 MiB blocks, 48 MiB scoped limit (2x double-buffered
    input blocks + tiny output + headroom).
    v7x (64 MiB): ~10.7 MiB blocks, 32 MiB scoped limit.
    """
    cap = _vmem_capacity_bytes()
    block = min(16 << 20, cap // 6)
    vmem_limit = min(cap // 2, max(32 << 20, 3 * block))
    return int(block), int(vmem_limit)


def _legal_tiles(dim, mult):
    """Tile sizes legal under the (8,128) BlockSpec rule for this dim."""
    opts = {t for t in range(mult, dim + 1, mult) if dim % t == 0}
    opts.add(dim)  # full extent is always legal
    return sorted(opts)


def _choose_tiles(n, c, s, itemsize, block_budget):
    """Pick (n_t, c_t) for input blocks (n_t, c_t, S) / output blocks (n_t, c_t).

    Legality: output needs n_t % 8 == 0 or n_t == N, and c_t % 128 == 0 or
    c_t == C; input's last-two dims (c_t, S) are then automatically legal.
    Bytes are accounted with VMEM padding (lanes to 128, sublanes per dtype).
    Preference: largest padded block that fits the budget, with >=2 total grid
    steps when possible (megacore), tie-breaking toward larger c_t.
    Returns (n_t, c_t, need_pad); need_pad=True means the caller should pad
    N->mult of 8 and C->mult of 128 and retry (no legal sub-tile fits).
    """
    sublane = max(8, 32 // itemsize)          # f32: 8, bf16: 16, int8/fp8: 32
    s_pad = -(-s // 128) * 128                # lane padding of the last dim

    def padded_bytes(n_t, c_t):
        return n_t * (-(-c_t // sublane) * sublane) * s_pad * itemsize

    combos = []
    for n_t in _legal_tiles(n, 8):
        for c_t in _legal_tiles(c, 128):
            steps = (n // n_t) * (c // c_t)
            combos.append((padded_bytes(n_t, c_t), c_t, n_t, steps))

    fitting = [cb for cb in combos if cb[0] <= block_budget]
    multi = [cb for cb in fitting if cb[3] >= 2]
    pool = multi or fitting
    if pool:
        _, c_t, n_t, _ = max(pool)            # max bytes, tie-break larger c_t
        return n_t, c_t, False

    # Nothing fits the budget. If the smallest legal tile is already at (or
    # below) the finest granularity padding could give us, just take it;
    # otherwise ask the wrapper to pad N/C so finer tiles become legal.
    smallest = min(combos)
    if smallest[2] <= 8 and smallest[1] <= 128:
        return smallest[2], smallest[1], False
    return 0, 0, True


def avg_head_forward(x, *, target_block_bytes=None, vmem_limit_bytes=None):
    """JAX/Pallas equivalent of AvgHead.forward. Returns (out, out)."""
    if x.ndim != 5:
        # Non-5D inputs just get flattened (no pooling), per the reference.
        out = x.reshape(x.shape[0], -1)
        return out, out

    n, c, t, h, w = x.shape
    s = t * h * w
    x_flat = x.reshape(n, c, s)
    itemsize = jnp.dtype(x.dtype).itemsize

    auto_block, auto_limit = _generation_budgets()
    block_budget = auto_block if target_block_bytes is None else target_block_bytes
    vmem_limit = auto_limit if vmem_limit_bytes is None else vmem_limit_bytes

    n_t, c_t, need_pad = _choose_tiles(n, c, s, itemsize, block_budget)
    n2, c2 = n, c
    if need_pad:
        # Indivisible N/C with no legal sub-tile that fits: zero-pad N to a
        # multiple of 8 and C to a multiple of 128 so fine tiles become legal;
        # padded rows/channels are sliced off the output (means of zeros).
        n2 = -(-n // 8) * 8
        c2 = -(-c // 128) * 128
        x_flat = jnp.pad(x_flat, ((0, n2 - n), (0, c2 - c), (0, 0)))
        n_t, c_t, _ = _choose_tiles(n2, c2, s, itemsize, block_budget)

    grid = (n2 // n_t, c2 // c_t)
    kernel = functools.partial(_avg_head_kernel, inv_s=1.0 / float(s))

    out = pl.pallas_call(
        kernel,
        out_shape=jax.ShapeDtypeStruct((n2, c2), x.dtype),
        grid_spec=pltpu.PrefetchScalarGridSpec(
            num_scalar_prefetch=0,
            grid=grid,
            in_specs=[pl.BlockSpec((n_t, c_t, s), lambda i, j: (i, j, 0))],
            out_specs=pl.BlockSpec((n_t, c_t), lambda i, j: (i, j)),
        ),
        compiler_params=pltpu.CompilerParams(
            dimension_semantics=("parallel", "parallel"),
            vmem_limit_bytes=int(vmem_limit),
        ),
        cost_estimate=pl.CostEstimate(
            flops=n2 * c2 * s,
            transcendentals=0,
            bytes_accessed=n2 * c2 * s * itemsize + n2 * c2 * itemsize,
        ),
    )(x_flat)

    if (n2, c2) != (n, c):
        out = out[:n, :c]

    # PyTorch returns two views of the same pooled tensor.
    return out, out


if __name__ == "__main__":
    key = jax.random.PRNGKey(0)
    k1, k2, k3, k4 = jax.random.split(key, 4)

    # 1) Tiny 5D f32 input (single-block path): (N, C, T, H, W) = (2, 4, 4, 8, 8).
    x1 = jax.random.normal(k1, (2, 4, 4, 8, 8), dtype=jnp.float32)
    out1, dup1 = avg_head_forward(x1)
    out1 = jax.block_until_ready(out1)
    dup1 = jax.block_until_ready(dup1)
    ref1 = jnp.mean(x1, axis=(2, 3, 4))
    assert out1.shape == (2, 4) and dup1.shape == (2, 4)
    assert jnp.allclose(out1, ref1, atol=1e-5, rtol=1e-5)
    assert jnp.allclose(dup1, ref1, atol=1e-5, rtol=1e-5)

    # 2) Modest f32 shape with a small block budget to force a multi-step grid
    #    (exercises the tiled / double-buffered path): (8, 256, 2, 8, 8).
    x2 = jax.random.normal(k2, (8, 256, 2, 8, 8), dtype=jnp.float32)
    out2, _ = avg_head_forward(x2, target_block_bytes=128 * 1024)
    out2 = jax.block_until_ready(out2)
    ref2 = jnp.mean(x2, axis=(2, 3, 4))
    assert out2.shape == (8, 256)
    assert jnp.allclose(out2, ref2, atol=1e-5, rtol=1e-5)

    # 3) bf16 input: sum accumulates in f32, output stays bf16.
    x3 = jax.random.normal(k3, (2, 8, 2, 8, 8), dtype=jnp.bfloat16)
    out3, _ = avg_head_forward(x3)
    out3 = jax.block_until_ready(out3)
    ref3 = jnp.mean(x3.astype(jnp.float32), axis=(2, 3, 4))
    assert out3.dtype == jnp.bfloat16
    assert jnp.allclose(out3.astype(jnp.float32), ref3, atol=1e-2, rtol=1e-2)

    # 4) Non-5D path: plain flatten, no pooling (matches the reference).
    x4 = jax.random.normal(k1, (2, 4, 16), dtype=jnp.float32)
    out4, dup4 = avg_head_forward(x4)
    assert out4.shape == (2, 64)
    assert jnp.allclose(out4, x4.reshape(2, -1))
    assert jnp.allclose(dup4, x4.reshape(2, -1))

    # 5) Indivisible N, C with a tight budget: exercises the pad-N/C fallback
    #    (N=12 has no mult-of-8 divisor, C=200 no mult-of-128 divisor).
    x5 = jax.random.normal(k4, (12, 200, 2, 8, 8), dtype=jnp.float32)
    out5, _ = avg_head_forward(x5, target_block_bytes=256 * 1024)
    out5 = jax.block_until_ready(out5)
    ref5 = jnp.mean(x5, axis=(2, 3, 4))
    assert out5.shape == (12, 200)
    assert jnp.allclose(out5, ref5, atol=1e-5, rtol=1e-5)

    print("KERNEL_OK")
</pallas_src>

<mosaic_0001>
module attributes {stable_mosaic.version = 11 : i64} {
  func.func @_avg_head_kernel(%arg0: i32, %arg1: i32, %arg2: memref<2x4x256xf32, #tpu.memory_space<vmem>>, %arg3: memref<2x4xf32, #tpu.memory_space<vmem>>) attributes {dimension_semantics = [#tpu.dimension_semantics<parallel>, #tpu.dimension_semantics<parallel>], iteration_bounds = array<i64: 1, 1>, scalar_prefetch = 0 : i64, scratch_operands = 0 : i64, tpu.core_type = #tpu.core_type<tc>, window_params = [{transform_indices = @transform_0, window_bounds = array<i64: 2, 4, 256>}, {transform_indices = @transform_1, window_bounds = array<i64: 2, 4>}]} {
    %c0 = arith.constant 0 : index
    %c0_0 = arith.constant 0 : index
    %c0_1 = arith.constant 0 : index
    %0 = vector.load %arg2[%c0, %c0_0, %c0_1] : memref<2x4x256xf32, #tpu.memory_space<vmem>>, vector<2x4x256xf32>
    %cst = arith.constant dense<0.000000e+00> : vector<2x4xf32>
    %1 = vector.multi_reduction <add>, %0, %cst [2] : vector<2x4x256xf32> to vector<2x4xf32>
    %cst_2 = arith.constant 3.906250e-03 : f32
    %2 = vector.broadcast %cst_2 : f32 to vector<2x4xf32>
    %3 = arith.mulf %1, %2 : vector<2x4xf32>
    %c0_3 = arith.constant 0 : index
    %c0_4 = arith.constant 0 : index
    %4 = vector.load %arg3[%c0_3, %c0_4] : memref<2x4xf32, #tpu.memory_space<vmem>>, vector<2x4xf32>
    tpu.vector_store %arg3[%c0_3, %c0_4], %3 {strides = array<i32>} : memref<2x4xf32, #tpu.memory_space<vmem>>, vector<2x4xf32>,
    return
  }
  func.func @transform_0(%arg0: i32, %arg1: i32) -> (i32, i32, i32) {
    %c0_i32 = arith.constant 0 : i32
    %c0_i32_0 = arith.constant 0 : i32
    return %arg0, %arg1, %c0_i32 : i32, i32, i32
  }
  func.func @transform_1(%arg0: i32, %arg1: i32) -> (i32, i32) {
    %c0_i32 = arith.constant 0 : i32
    return %arg0, %arg1 : i32, i32
  }
}

</mosaic_0001>

<bundles_post_ra>
// kernel: tpu_custom_call.1
= control target key start
LH: loop header
LB: loop body
LE: loop exit
PB: predicated region body
PF: predicated region fallthrough
CT: control target
= control target key end

     0   :  { %6 = vsyncpa [#allocation3], 0  ;;  %s157_s0 = inlined_call_operand.hbm [shape: f32[2,4,256], index: 0, kind: input, shape index: {}]   ;;  %s158_s1 = inlined_call_operand.hbm [shape: f32[2,4], index: 1, kind: output, shape index: {}]  }
   0x1   :  { %7 = vsyncpa [#allocation4], 0  ;;  %s12_s8 = sshll.u32 %s157_s0, 4  ;;  %s137_s9 = smov [#allocation2]   ;;  %s13_s8 = int_to_ptr.hbm [resolvable:$true] %s12_s8 }
   0x2   :  { %s14_s10 = sshll.u32 %s137_s9, 4  ;;  %s138_s11 = smov 128   ;;  %s15_s10 = int_to_ptr.vmem [resolvable:$true] %s14_s10 }
   0x3   :  { %s139_s12 = smov 8  }
   0x4   :  { %20 = dma.hbm_to_vmem [thread:$0]  %s13_s8, 256, %s15_s10, [#allocation3], %s138_s11, %s138_s11, %s139_s12  }
   0x5   :  { %133 = dma.done.wait [#allocation3], 256  }
   0x6   :  { %134 = vsyncadd [#allocation3], 4294967040  ;;  %v25_v0 = vld [vmem:[#allocation2] sm:$0xff]  ;;  %v26_v1 = vld [vmem:[#allocation2 + $0x8] sm:$0xff]  ;;  %vm40_vm0 = vcmask 1043456   ;;  %v55_v13 = vlaneseq  ;;  %s140_s0 = smov [#allocation5]  }
   0x7   :  { %29 = vst [vmem:[#allocation1] ss:$2 sm:$0xff] %v25_v0  ;;  %s69_s13 = sshll.u32 %s140_s0, 4  ;;  %s71_s16 = sshll.u32 %s158_s1, 4  ;;  %vm59_vm1 = vcmask 1041409   ;;  %vm62_vm2 = vcmask 25600   ;;  %s70_s13 = int_to_ptr.vmem [resolvable:$true] %s69_s13  ;;  %s72_s16 = int_to_ptr.hbm [resolvable:$true] %s71_s16 }
   0x8   :  { %33 = vst [vmem:[#allocation1 + $0x10] ss:$2 sm:$0xff] %v26_v1  ;;  %v56_v14 = vand.u32 127, %v55_v13 }
   0xe   :  { %v30_v2 = vld.sshfl [vmem:[#allocation1] sm:$0xff pattern:$0x75316420]  ;;  %v31_v3 = vld.sshfl [vmem:[#allocation1 + $0x8] sm:$0xff pattern:$0x75316420] }
   0xf   :  { %v41_v4 = vsel %vm40_vm0, %v30_v2, 0.0  ;;  %v42_v5 = vsel %vm40_vm0, %v31_v3, 0.0  ;;  %v34_v7 = vld.sshfl [vmem:[#allocation1 + $0x10] sm:$0xff pattern:$0x75316420] }
  0x10   :  { %v43_v6 = vadd.f32 %v42_v5, %v41_v4  ;;  %v35_v8 = vld.sshfl [vmem:[#allocation1 + $0x18] sm:$0xff pattern:$0x75316420]  ;;  %v46_v9 = vsel %vm40_vm0, %v34_v7, 0.0 }
  0x11   :  { %v47_v10 = vsel %vm40_vm0, %v35_v8, 0.0 }
  0x12   :  { %44 = vadd.xlane.f32.xlu0 %v43_v6  ;;  %v48_v11 = vadd.f32 %v47_v10, %v46_v9 }
  0x1a   :  { %49 = vadd.xlane.f32.xlu0 %v48_v11 }
  0x85   :  { %v45_v12 = vpop.xlane.xlu0 %44 }
  0x86   :  { %v51_v15 = vmul.f32 0.00390625, %v45_v12 }
  0x88   :  { %v57_v18 = vperm.slane %v51_v15, %v56_v14 }
  0x8d   :  { %v50_v16 = vpop.xlane.xlu0 %49 }
  0x8e   :  { %v52_v17 = vmul.f32 0.00390625, %v50_v16 }
  0x90   :  { %v58_v19 = vperm.slane %v52_v17, %v56_v14 }
  0x92   :  { %v60_v20 = vsel %vm59_vm1, %v58_v19, %v57_v18 }
  0x93   :  { %63 = vst.msk [vmem:[#allocation5] sm:$0x3] %vm62_vm2, %v60_v20 }
  0x94   :  { %74 = dma.vmem_to_hbm [thread:$0]  %s70_s13, 32, %s72_s16, [#allocation4]  }
  0x95   :  { %135 = dma.done.wait [#allocation4], 32  }
  0x96   :  { %136 = vsyncadd [#allocation4], 4294967264 }
  0x97   :  { %79 = vsyncpa [#allocation3], 1 }
  0x98   :  { %80 = vsyncpa [#allocation4], 1 }

</bundles_post_ra>
